<compile_context>
chip_gen: v5e
topology: v5e:2x2
jax: 0.10.0
libtpu: 0.0.40
codegen_flags: <defaults>
</compile_context>

<pallas_src>
import jax
import jax.numpy as jnp
from jax.experimental import pallas as pl
from jax.experimental.pallas import tpu as pltpu


# Flipped to False (once) if this Pallas build rejects single-buffered specs.
_BUFFERED_1_OK = True


def _round_up(n: int, m: int) -> int:
    return ((n + m - 1) // m) * m


def _cdiv(a: int, b: int) -> int:
    return -(-a // b)


def _pick_batch_tile(B: int, block_m: int):
    """Batch tile (multiple of 8 sublanes) sized so the last tile isn't mostly pad."""
    n_tiles = max(1, _cdiv(B, block_m))
    tm = _round_up(_cdiv(B, n_tiles), 8)
    return tm, _cdiv(B, tm)


def _vmem_limit_bytes(per_tile_bytes: int, resident_bytes: int) -> int:
    needed = 2 * per_tile_bytes + resident_bytes   # double-buffered tiles + resident weights
    return int(min(64 * 1024 * 1024, max(32 * 1024 * 1024, 2 * needed)))


def _sigmoid(x):
    # tanh-based logistic: lowers cleanly to the EUP and is stable for both signs.
    return 0.5 * (jnp.tanh(0.5 * x) + 1.0)


# ----------------------------------------------------------------------------
# One-time parameter packing (do NOT call per step).
# ----------------------------------------------------------------------------
def prepare_lstm_params(w_ih, w_hh, b_ih, b_hh, compute_dtype=jnp.bfloat16):
    """Pack PyTorch-layout nn.LSTMCell params (gate order i, f, g, o).

    w_ih: (4H, I), w_hh: (4H, H), b_*: (4H,).
    Returns (w_ih_t, w_hh_t, bias):
      w_ih_t: (I, 4H) compute_dtype  -- gate-major columns (= w_ih.T)
      w_hh_t: (H, 4H) compute_dtype
      bias:   (1, 4H) float32        -- b_ih + b_hh, fused once

    compute_dtype=float32 is for validation only; production should use bf16
    (v5e/v6e MXUs are bf16-native; f32 matmul is a multi-pass ~3x slower path
    and doubles weight HBM/VMEM bytes).
    """
    w_ih_t = jnp.asarray(w_ih).T.astype(compute_dtype)
    w_hh_t = jnp.asarray(w_hh).T.astype(compute_dtype)
    bias = (jnp.asarray(b_ih, jnp.float32) + jnp.asarray(b_hh, jnp.float32))[None, :]
    return w_ih_t, w_hh_t, bias


# ----------------------------------------------------------------------------
# Kernel bodies
# ----------------------------------------------------------------------------
def _lstm_cell_kernel(x_ref, h_ref, c_ref, wih_ref, whh_ref, b_ref,
                      h_out_ref, c_out_ref):
    H = c_out_ref.shape[1]
    cdt = wih_ref.dtype    # MXU compute dtype (weights' dtype)

    gates = (
        jnp.dot(x_ref[...].astype(cdt), wih_ref[...],
                preferred_element_type=jnp.float32)
        + jnp.dot(h_ref[...].astype(cdt), whh_ref[...],
                  preferred_element_type=jnp.float32)
        + b_ref[...]
    )
    # Gate order matches PyTorch: i, f, g, o. Lane-aligned slabs when H % 128 == 0.
    i_g = _sigmoid(gates[:, 0 * H:1 * H])
    f_g = _sigmoid(gates[:, 1 * H:2 * H])
    g_g = jnp.tanh(gates[:, 2 * H:3 * H])
    o_g = _sigmoid(gates[:, 3 * H:4 * H])

    c_t = f_g * c_ref[...].astype(jnp.float32) + i_g * g_g   # cell state in f32
    h_t = o_g * jnp.tanh(c_t)

    h_out_ref[...] = h_t.astype(h_out_ref.dtype)
    c_out_ref[...] = c_t.astype(c_out_ref.dtype)


def _lstm_seq_kernel(x_ref, h0_ref, c0_ref, wih_ref, whh_ref, b_ref,
                     hseq_ref, hlast_ref, clast_ref, h_sc, c_sc):
    t = pl.program_id(1)

    @pl.when(t == 0)
    def _():
        h_sc[...] = h0_ref[...].astype(jnp.float32)
        c_sc[...] = c0_ref[...].astype(jnp.float32)

    H = c_sc.shape[1]
    cdt = wih_ref.dtype

    gates = (
        jnp.dot(x_ref[0].astype(cdt), wih_ref[...],
                preferred_element_type=jnp.float32)
        + jnp.dot(h_sc[...].astype(cdt), whh_ref[...],
                  preferred_element_type=jnp.float32)
        + b_ref[...]
    )
    i_g = _sigmoid(gates[:, 0 * H:1 * H])
    f_g = _sigmoid(gates[:, 1 * H:2 * H])
    g_g = jnp.tanh(gates[:, 2 * H:3 * H])
    o_g = _sigmoid(gates[:, 3 * H:4 * H])

    c_t = f_g * c_sc[...] + i_g * g_g
    h_t = o_g * jnp.tanh(c_t)
    h_sc[...] = h_t
    c_sc[...] = c_t

    hseq_ref[0] = h_t.astype(hseq_ref.dtype)
    hlast_ref[...] = h_t.astype(hlast_ref.dtype)
    clast_ref[...] = c_t.astype(clast_ref.dtype)


# ----------------------------------------------------------------------------
# Per-step wrapper (== LSTMCell.forward, eval mode)
# ----------------------------------------------------------------------------
def lstm_cell_pallas(x, h_tm1, c_tm1, params, *, block_m=256):
    """One nn.LSTMCell step. x: (B, I); h_tm1, c_tm1: (B, H)."""
    w_ih_t, w_hh_t, bias = params
    B, I = x.shape
    H = h_tm1.shape[1]
    fourH = 4 * H
    tm, n_tiles = _pick_batch_tile(B, block_m)

    resident_bytes = (w_ih_t.size * w_ih_t.dtype.itemsize
                      + w_hh_t.size * w_hh_t.dtype.itemsize
                      + bias.size * bias.dtype.itemsize)
    tile_bytes = tm * (I * x.dtype.itemsize + 4 * H * h_tm1.dtype.itemsize
                       + 4 * fourH)  # in/out tiles + f32 gate buffer
    vmem_limit = _vmem_limit_bytes(tile_bytes, resident_bytes)

    cost = pl.CostEstimate(
        flops=2 * B * (I + H) * fourH,
        transcendentals=5 * B * H,
        bytes_accessed=resident_bytes
        + B * (I * x.dtype.itemsize + 4 * H * h_tm1.dtype.itemsize),
    )

    def _call(single_buffer):
        w_kwargs = {"pipeline_mode": pl.Buffered(1)} if single_buffer else {}
        resident = lambda shape: pl.BlockSpec(shape, lambda i: (0, 0), **w_kwargs)
        return pl.pallas_call(
            _lstm_cell_kernel,
            grid=(n_tiles,),
            in_specs=[
                pl.BlockSpec((tm, I), lambda i: (i, 0)),   # x batch tile
                pl.BlockSpec((tm, H), lambda i: (i, 0)),   # h batch tile
                pl.BlockSpec((tm, H), lambda i: (i, 0)),   # c batch tile
                resident((I, fourH)),                      # W_ih^T  (VMEM resident)
                resident((H, fourH)),                      # W_hh^T  (VMEM resident)
                resident((1, fourH)),                      # fused bias
            ],
            out_specs=(
                pl.BlockSpec((tm, H), lambda i: (i, 0)),
                pl.BlockSpec((tm, H), lambda i: (i, 0)),
            ),
            out_shape=(
                jax.ShapeDtypeStruct((B, H), h_tm1.dtype),
                jax.ShapeDtypeStruct((B, H), c_tm1.dtype),
            ),
            compiler_params=pltpu.CompilerParams(
                dimension_semantics=("parallel",),
                vmem_limit_bytes=vmem_limit),
            cost_estimate=cost,
        )(x, h_tm1, c_tm1, w_ih_t, w_hh_t, bias)

    global _BUFFERED_1_OK
    if _BUFFERED_1_OK:
        try:
            return _call(True)
        except Exception:
            _BUFFERED_1_OK = False
    return _call(False)


def lstm_cell_module_forward(x, h_tm1, params, *, block_m=256):
    """Eval-mode equivalent of modules/base.py::LSTMCell.forward(x, (h, c))."""
    h, c = h_tm1
    return lstm_cell_pallas(x, h, c, params, block_m=block_m)


# ----------------------------------------------------------------------------
# Fused full-sequence wrapper (weights resident across all timesteps)
# ----------------------------------------------------------------------------
def lstm_sequence_pallas(x_seq, h0, c0, params, *, block_m=256):
    """x_seq: (T, B, I) -> (h_seq (T, B, H), h_T (B, H), c_T (B, H)).

    One pallas_call with grid (B/tm, T); h/c are carried in f32 VMEM scratch, so
    per-step HBM traffic is only the x_t tile in and the h_t tile out, and the
    weight matrices are read from HBM once per batch tile instead of once per step.
    """
    w_ih_t, w_hh_t, bias = params
    T, B, I = x_seq.shape
    H = h0.shape[1]
    fourH = 4 * H
    tm, n_tiles = _pick_batch_tile(B, block_m)

    resident_bytes = (w_ih_t.size * w_ih_t.dtype.itemsize
                      + w_hh_t.size * w_hh_t.dtype.itemsize
                      + bias.size * bias.dtype.itemsize)
    tile_bytes = tm * (I * x_seq.dtype.itemsize + 4 * H * h0.dtype.itemsize
                       + 4 * fourH + 8 * H)   # io tiles + gate buffer + f32 scratch
    vmem_limit = _vmem_limit_bytes(tile_bytes, resident_bytes)

    cost = pl.CostEstimate(
        flops=2 * T * B * (I + H) * fourH,
        transcendentals=5 * T * B * H,
        bytes_accessed=resident_bytes
        + T * B * I * x_seq.dtype.itemsize
        + (T + 4) * B * H * h0.dtype.itemsize,
    )

    def _call(single_buffer):
        w_kwargs = {"pipeline_mode": pl.Buffered(1)} if single_buffer else {}
        resident = lambda shape: pl.BlockSpec(shape, lambda b, t: (0, 0), **w_kwargs)
        return pl.pallas_call(
            _lstm_seq_kernel,
            grid=(n_tiles, T),
            in_specs=[
                pl.BlockSpec((1, tm, I), lambda b, t: (t, b, 0)),   # x_t tile
                pl.BlockSpec((tm, H), lambda b, t: (b, 0)),          # h0 tile
                pl.BlockSpec((tm, H), lambda b, t: (b, 0)),          # c0 tile
                resident((I, fourH)),
                resident((H, fourH)),
                resident((1, fourH)),
            ],
            out_specs=(
                pl.BlockSpec((1, tm, H), lambda b, t: (t, b, 0)),    # h_t per step
                pl.BlockSpec((tm, H), lambda b, t: (b, 0)),          # h_T
                pl.BlockSpec((tm, H), lambda b, t: (b, 0)),          # c_T
            ),
            out_shape=(
                jax.ShapeDtypeStruct((T, B, H), h0.dtype),
                jax.ShapeDtypeStruct((B, H), h0.dtype),
                jax.ShapeDtypeStruct((B, H), c0.dtype),
            ),
            scratch_shapes=[
                pltpu.VMEM((tm, H), jnp.float32),   # h carry
                pltpu.VMEM((tm, H), jnp.float32),   # c carry
            ],
            compiler_params=pltpu.CompilerParams(
                dimension_semantics=("parallel", "arbitrary"),
                vmem_limit_bytes=vmem_limit),
            cost_estimate=cost,
        )(x_seq, h0, c0, w_ih_t, w_hh_t, bias)

    global _BUFFERED_1_OK
    if _BUFFERED_1_OK:
        try:
            return _call(True)
        except Exception:
            _BUFFERED_1_OK = False
    return _call(False)


# ----------------------------------------------------------------------------
# Pure-JAX reference matching torch.nn.LSTMCell semantics.
# ----------------------------------------------------------------------------
def lstm_cell_ref(x, h_tm1, c_tm1, w_ih, w_hh, b_ih, b_hh):
    H = h_tm1.shape[1]
    hi = jax.lax.Precision.HIGHEST
    gates = (jnp.dot(x, w_ih.T, precision=hi) + b_ih
             + jnp.dot(h_tm1, w_hh.T, precision=hi) + b_hh)
    i_g = jax.nn.sigmoid(gates[:, 0 * H:1 * H])
    f_g = jax.nn.sigmoid(gates[:, 1 * H:2 * H])
    g_g = jnp.tanh(gates[:, 2 * H:3 * H])
    o_g = jax.nn.sigmoid(gates[:, 3 * H:4 * H])
    c_t = f_g * c_tm1 + i_g * g_g
    h_t = o_g * jnp.tanh(c_t)
    return h_t, c_t


if __name__ == "__main__":
    input_size = 16
    hidden_size = 32
    batch = 8
    seq_len = 6
    dtype = jnp.float32

    key = jax.random.PRNGKey(0)
    keys = jax.random.split(key, 8)

    # Same shapes / uniform(-1/sqrt(H), 1/sqrt(H)) init scheme as nn.LSTMCell.
    bound = 1.0 / (hidden_size ** 0.5)
    w_ih = jax.random.uniform(keys[0], (4 * hidden_size, input_size), dtype, -bound, bound)
    w_hh = jax.random.uniform(keys[1], (4 * hidden_size, hidden_size), dtype, -bound, bound)
    b_ih = jax.random.uniform(keys[2], (4 * hidden_size,), dtype, -bound, bound)
    b_hh = jax.random.uniform(keys[3], (4 * hidden_size,), dtype, -bound, bound)

    x = jax.random.normal(keys[4], (batch, input_size), dtype)
    h0 = jax.random.normal(keys[5], (batch, hidden_size), dtype)
    c0 = jax.random.normal(keys[6], (batch, hidden_size), dtype)
    x_seq = jax.random.normal(keys[7], (seq_len, batch, input_size), dtype)

    h_r, c_r = lstm_cell_ref(x, h0, c0, w_ih, w_hh, b_ih, b_hh)

    # --- f32 MXU path: validation against the reference ---------------------
    params_f32 = prepare_lstm_params(w_ih, w_hh, b_ih, b_hh, compute_dtype=jnp.float32)
    h_t, c_t = lstm_cell_module_forward(x, (h0, c0), params_f32)
    jax.block_until_ready((h_t, c_t))
    assert h_t.shape == (batch, hidden_size) and c_t.shape == (batch, hidden_size)
    assert jnp.allclose(h_t, h_r, atol=2e-4, rtol=2e-4)
    assert jnp.allclose(c_t, c_r, atol=2e-4, rtol=2e-4)

    # --- bf16 MXU path (production setting): looser tolerance ---------------
    params_bf16 = prepare_lstm_params(w_ih, w_hh, b_ih, b_hh, compute_dtype=jnp.bfloat16)
    h_b, c_b = lstm_cell_pallas(x, h0, c0, params_bf16)
    jax.block_until_ready((h_b, c_b))
    assert jnp.allclose(h_b, h_r, atol=3e-2, rtol=3e-2)
    assert jnp.allclose(c_b, c_r, atol=3e-2, rtol=3e-2)

    # --- fused sequence kernel vs. stepping the reference --------------------
    hs_ref = []
    h_rt, c_rt = h0, c0
    for t in range(seq_len):
        h_rt, c_rt = lstm_cell_ref(x_seq[t], h_rt, c_rt, w_ih, w_hh, b_ih, b_hh)
        hs_ref.append(h_rt)
    hs_ref = jnp.stack(hs_ref)

    h_seq, h_T, c_T = lstm_sequence_pallas(x_seq, h0, c0, params_f32)
    jax.block_until_ready((h_seq, h_T, c_T))
    assert h_seq.shape == (seq_len, batch, hidden_size)
    assert jnp.allclose(h_seq, hs_ref, atol=5e-4, rtol=5e-4)
    assert jnp.allclose(h_T, h_rt, atol=5e-4, rtol=5e-4)
    assert jnp.allclose(c_T, c_rt, atol=5e-4, rtol=5e-4)

    print("KERNEL_OK")
</pallas_src>

<mosaic_0001>
module attributes {stable_mosaic.version = 11 : i64} {
  func.func @_lstm_cell_kernel(%arg0: i32, %arg1: memref<8x16xf32, #tpu.memory_space<vmem>>, %arg2: memref<8x32xf32, #tpu.memory_space<vmem>>, %arg3: memref<8x32xf32, #tpu.memory_space<vmem>>, %arg4: memref<16x128xf32, #tpu.memory_space<vmem>>, %arg5: memref<32x128xf32, #tpu.memory_space<vmem>>, %arg6: memref<1x128xf32, #tpu.memory_space<vmem>>, %arg7: memref<8x32xf32, #tpu.memory_space<vmem>>, %arg8: memref<8x32xf32, #tpu.memory_space<vmem>>) attributes {dimension_semantics = [#tpu.dimension_semantics<parallel>], iteration_bounds = array<i64: 1>, scalar_prefetch = 0 : i64, scratch_operands = 0 : i64, tpu.core_type = #tpu.core_type<tc>, window_params = [{transform_indices = @transform_0, window_bounds = array<i64: 8, 16>}, {transform_indices = @transform_1, window_bounds = array<i64: 8, 32>}, {transform_indices = @transform_2, window_bounds = array<i64: 8, 32>}, {pipeline_mode = #tpu.pipeline_mode<synchronous>, transform_indices = @transform_3, window_bounds = array<i64: 16, 128>}, {pipeline_mode = #tpu.pipeline_mode<synchronous>, transform_indices = @transform_4, window_bounds = array<i64: 32, 128>}, {pipeline_mode = #tpu.pipeline_mode<synchronous>, transform_indices = @transform_5, window_bounds = array<i64: 1, 128>}, {transform_indices = @transform_6, window_bounds = array<i64: 8, 32>}, {transform_indices = @transform_7, window_bounds = array<i64: 8, 32>}]} {
    %c0 = arith.constant 0 : index
    %c0_0 = arith.constant 0 : index
    %0 = vector.load %arg1[%c0, %c0_0] : memref<8x16xf32, #tpu.memory_space<vmem>>, vector<8x16xf32>
    %c0_1 = arith.constant 0 : index
    %c0_2 = arith.constant 0 : index
    %1 = vector.load %arg4[%c0_1, %c0_2] : memref<16x128xf32, #tpu.memory_space<vmem>>, vector<16x128xf32>
    %cst = arith.constant dense<0.000000e+00> : vector<8x128xf32>
    %2 = tpu.matmul %0, %1, %cst {dimension_numbers = #tpu.dot_dimension_numbers<[1], [0], [0], [1], [0, 0, 1, 1], [], []>} : vector<8x16xf32>, vector<16x128xf32>, vector<8x128xf32> -> vector<8x128xf32>
    %c0_3 = arith.constant 0 : index
    %c0_4 = arith.constant 0 : index
    %3 = vector.load %arg2[%c0_3, %c0_4] : memref<8x32xf32, #tpu.memory_space<vmem>>, vector<8x32xf32>
    %c0_5 = arith.constant 0 : index
    %c0_6 = arith.constant 0 : index
    %4 = vector.load %arg5[%c0_5, %c0_6] : memref<32x128xf32, #tpu.memory_space<vmem>>, vector<32x128xf32>
    %cst_7 = arith.constant dense<0.000000e+00> : vector<8x128xf32>
    %5 = tpu.matmul %3, %4, %cst_7 {dimension_numbers = #tpu.dot_dimension_numbers<[1], [0], [0], [1], [0, 0, 1, 1], [], []>} : vector<8x32xf32>, vector<32x128xf32>, vector<8x128xf32> -> vector<8x128xf32>
    %6 = arith.addf %2, %5 : vector<8x128xf32>
    %c0_8 = arith.constant 0 : index
    %c0_9 = arith.constant 0 : index
    %7 = vector.load %arg6[%c0_8, %c0_9] : memref<1x128xf32, #tpu.memory_space<vmem>>, vector<1x128xf32>
    %8 = vector.broadcast %7 : vector<1x128xf32> to vector<8x128xf32>
    %9 = arith.addf %6, %8 : vector<8x128xf32>
    %10 = vector.extract_strided_slice %9 {offsets = [0, 0], sizes = [8, 32], strides = [1, 1]} : vector<8x128xf32> to vector<8x32xf32>
    %cst_10 = arith.constant 5.000000e-01 : f32
    %11 = vector.broadcast %cst_10 : f32 to vector<8x32xf32>
    %12 = arith.mulf %11, %10 : vector<8x32xf32>
    %13 = math.tanh %12 : vector<8x32xf32>
    %cst_11 = arith.constant 1.000000e+00 : f32
    %14 = vector.broadcast %cst_11 : f32 to vector<8x32xf32>
    %15 = arith.addf %13, %14 : vector<8x32xf32>
    %cst_12 = arith.constant 5.000000e-01 : f32
    %16 = vector.broadcast %cst_12 : f32 to vector<8x32xf32>
    %17 = arith.mulf %16, %15 : vector<8x32xf32>
    %18 = vector.extract_strided_slice %9 {offsets = [0, 32], sizes = [8, 32], strides = [1, 1]} : vector<8x128xf32> to vector<8x32xf32>
    %cst_13 = arith.constant 5.000000e-01 : f32
    %19 = vector.broadcast %cst_13 : f32 to vector<8x32xf32>
    %20 = arith.mulf %19, %18 : vector<8x32xf32>
    %21 = math.tanh %20 : vector<8x32xf32>
    %cst_14 = arith.constant 1.000000e+00 : f32
    %22 = vector.broadcast %cst_14 : f32 to vector<8x32xf32>
    %23 = arith.addf %21, %22 : vector<8x32xf32>
    %cst_15 = arith.constant 5.000000e-01 : f32
    %24 = vector.broadcast %cst_15 : f32 to vector<8x32xf32>
    %25 = arith.mulf %24, %23 : vector<8x32xf32>
    %26 = vector.extract_strided_slice %9 {offsets = [0, 64], sizes = [8, 32], strides = [1, 1]} : vector<8x128xf32> to vector<8x32xf32>
    %27 = math.tanh %26 : vector<8x32xf32>
    %28 = vector.extract_strided_slice %9 {offsets = [0, 96], sizes = [8, 32], strides = [1, 1]} : vector<8x128xf32> to vector<8x32xf32>
    %cst_16 = arith.constant 5.000000e-01 : f32
    %29 = vector.broadcast %cst_16 : f32 to vector<8x32xf32>
    %30 = arith.mulf %29, %28 : vector<8x32xf32>
    %31 = math.tanh %30 : vector<8x32xf32>
    %cst_17 = arith.constant 1.000000e+00 : f32
    %32 = vector.broadcast %cst_17 : f32 to vector<8x32xf32>
    %33 = arith.addf %31, %32 : vector<8x32xf32>
    %cst_18 = arith.constant 5.000000e-01 : f32
    %34 = vector.broadcast %cst_18 : f32 to vector<8x32xf32>
    %35 = arith.mulf %34, %33 : vector<8x32xf32>
    %c0_19 = arith.constant 0 : index
    %c0_20 = arith.constant 0 : index
    %36 = vector.load %arg3[%c0_19, %c0_20] : memref<8x32xf32, #tpu.memory_space<vmem>>, vector<8x32xf32>
    %37 = arith.mulf %25, %36 : vector<8x32xf32>
    %38 = arith.mulf %17, %27 : vector<8x32xf32>
    %39 = arith.addf %37, %38 : vector<8x32xf32>
    %40 = math.tanh %39 : vector<8x32xf32>
    %41 = arith.mulf %35, %40 : vector<8x32xf32>
    %c0_21 = arith.constant 0 : index
    %c0_22 = arith.constant 0 : index
    %42 = vector.load %arg7[%c0_21, %c0_22] : memref<8x32xf32, #tpu.memory_space<vmem>>, vector<8x32xf32>
    tpu.vector_store %arg7[%c0_21, %c0_22], %41 {strides = array<i32>} : memref<8x32xf32, #tpu.memory_space<vmem>>, vector<8x32xf32>,
    %c0_23 = arith.constant 0 : index
    %c0_24 = arith.constant 0 : index
    %43 = vector.load %arg8[%c0_23, %c0_24] : memref<8x32xf32, #tpu.memory_space<vmem>>, vector<8x32xf32>
    tpu.vector_store %arg8[%c0_23, %c0_24], %39 {strides = array<i32>} : memref<8x32xf32, #tpu.memory_space<vmem>>, vector<8x32xf32>,
    return
  }
  func.func @transform_0(%arg0: i32) -> (i32, i32) {
    %c0_i32 = arith.constant 0 : i32
    %c0_i32_0 = arith.constant 0 : i32
    return %arg0, %c0_i32 : i32, i32
  }
  func.func @transform_1(%arg0: i32) -> (i32, i32) {
    %c0_i32 = arith.constant 0 : i32
    %c0_i32_0 = arith.constant 0 : i32
    return %arg0, %c0_i32 : i32, i32
  }
  func.func @transform_2(%arg0: i32) -> (i32, i32) {
    %c0_i32 = arith.constant 0 : i32
    %c0_i32_0 = arith.constant 0 : i32
    return %arg0, %c0_i32 : i32, i32
  }
  func.func @transform_3(%arg0: i32) -> (i32, i32) {
    %c0_i32 = arith.constant 0 : i32
    %c0_i32_0 = arith.constant 0 : i32
    %c0_i32_1 = arith.constant 0 : i32
    return %c0_i32, %c0_i32_0 : i32, i32
  }
  func.func @transform_4(%arg0: i32) -> (i32, i32) {
    %c0_i32 = arith.constant 0 : i32
    %c0_i32_0 = arith.constant 0 : i32
    %c0_i32_1 = arith.constant 0 : i32
    return %c0_i32, %c0_i32_0 : i32, i32
  }
  func.func @transform_5(%arg0: i32) -> (i32, i32) {
    %c0_i32 = arith.constant 0 : i32
    %c0_i32_0 = arith.constant 0 : i32
    %c0_i32_1 = arith.constant 0 : i32
    return %c0_i32, %c0_i32_0 : i32, i32
  }
  func.func @transform_6(%arg0: i32) -> (i32, i32) {
    %c0_i32 = arith.constant 0 : i32
    %c0_i32_0 = arith.constant 0 : i32
    return %arg0, %c0_i32 : i32, i32
  }
  func.func @transform_7(%arg0: i32) -> (i32, i32) {
    %c0_i32 = arith.constant 0 : i32
    %c0_i32_0 = arith.constant 0 : i32
    return %arg0, %c0_i32 : i32, i32
  }
}

module attributes {stable_mosaic.version = 11 : i64} {
  func.func @_lstm_cell_kernel(%arg0: i32, %arg1: memref<8x16xf32, #tpu.memory_space<vmem>>, %arg2: memref<8x32xf32, #tpu.memory_space<vmem>>, %arg3: memref<8x32xf32, #tpu.memory_space<vmem>>, %arg4: memref<16x128xf32, #tpu.memory_space<vmem>>, %arg5: memref<32x128xf32, #tpu.memory_space<vmem>>, %arg6: memref<1x128xf32, #tpu.memory_space<vmem>>, %arg7: memref<8x32xf32, #tpu.memory_space<vmem>>, %arg8: memref<8x32xf32, #tpu.memory_space<vmem>>) attributes {dimension_semantics = [#tpu.dimension_semantics<parallel>], iteration_bounds = array<i64: 1>, scalar_prefetch = 0 : i64, scratch_operands = 0 : i64, tpu.core_type = #tpu.core_type<tc>, window_params = [{transform_indices = @transform_0, window_bounds = array<i64: 8, 16>}, {transform_indices = @transform_1, window_bounds = array<i64: 8, 32>}, {transform_indices = @transform_2, window_bounds = array<i64: 8, 32>}, {pipeline_mode = #tpu.pipeline_mode<synchronous>, transform_indices = @transform_3, window_bounds = array<i64: 16, 128>}, {pipeline_mode = #tpu.pipeline_mode<synchronous>, transform_indices = @transform_4, window_bounds = array<i64: 32, 128>}, {pipeline_mode = #tpu.pipeline_mode<synchronous>, transform_indices = @transform_5, window_bounds = array<i64: 1, 128>}, {transform_indices = @transform_6, window_bounds = array<i64: 8, 32>}, {transform_indices = @transform_7, window_bounds = array<i64: 8, 32>}]} {
    %c0 = arith.constant 0 : index
    %c0_0 = arith.constant 0 : index
    %0 = vector.load %arg1[%c0, %c0_0] : memref<8x16xf32, #tpu.memory_space<vmem>>, vector<8x16xf32>
    %c0_1 = arith.constant 0 : index
    %c0_2 = arith.constant 0 : index
    %1 = vector.load %arg4[%c0_1, %c0_2] : memref<16x128xf32, #tpu.memory_space<vmem>>, vector<16x128xf32>
    %cst = arith.constant dense<0.000000e+00> : vector<8x128xf32>
    %2 = tpu.matmul %0, %1, %cst {dimension_numbers = #tpu.dot_dimension_numbers<[1], [0], [0], [1], [0, 0, 1, 1], [], []>} : vector<8x16xf32>, vector<16x128xf32>, vector<8x128xf32> -> vector<8x128xf32>
    %c0_3 = arith.constant 0 : index
    %c0_4 = arith.constant 0 : index
    %3 = vector.load %arg2[%c0_3, %c0_4] : memref<8x32xf32, #tpu.memory_space<vmem>>, vector<8x32xf32>
    %c0_5 = arith.constant 0 : index
    %c0_6 = arith.constant 0 : index
    %4 = vector.load %arg5[%c0_5, %c0_6] : memref<32x128xf32, #tpu.memory_space<vmem>>, vector<32x128xf32>
    %cst_7 = arith.constant dense<0.000000e+00> : vector<8x128xf32>
    %5 = tpu.matmul %3, %4, %cst_7 {dimension_numbers = #tpu.dot_dimension_numbers<[1], [0], [0], [1], [0, 0, 1, 1], [], []>} : vector<8x32xf32>, vector<32x128xf32>, vector<8x128xf32> -> vector<8x128xf32>
    %6 = arith.addf %2, %5 : vector<8x128xf32>
    %c0_8 = arith.constant 0 : index
    %c0_9 = arith.constant 0 : index
    %7 = vector.load %arg6[%c0_8, %c0_9] : memref<1x128xf32, #tpu.memory_space<vmem>>, vector<1x128xf32>
    %8 = vector.broadcast %7 : vector<1x128xf32> to vector<8x128xf32>
    %9 = arith.addf %6, %8 : vector<8x128xf32>
    %10 = vector.extract_strided_slice %9 {offsets = [0, 0], sizes = [8, 32], strides = [1, 1]} : vector<8x128xf32> to vector<8x32xf32>
    %cst_10 = arith.constant 5.000000e-01 : f32
    %11 = vector.broadcast %cst_10 : f32 to vector<8x32xf32>
    %12 = arith.mulf %11, %10 : vector<8x32xf32>
    %13 = math.tanh %12 : vector<8x32xf32>
    %cst_11 = arith.constant 1.000000e+00 : f32
    %14 = vector.broadcast %cst_11 : f32 to vector<8x32xf32>
    %15 = arith.addf %13, %14 : vector<8x32xf32>
    %cst_12 = arith.constant 5.000000e-01 : f32
    %16 = vector.broadcast %cst_12 : f32 to vector<8x32xf32>
    %17 = arith.mulf %16, %15 : vector<8x32xf32>
    %18 = vector.extract_strided_slice %9 {offsets = [0, 32], sizes = [8, 32], strides = [1, 1]} : vector<8x128xf32> to vector<8x32xf32>
    %cst_13 = arith.constant 5.000000e-01 : f32
    %19 = vector.broadcast %cst_13 : f32 to vector<8x32xf32>
    %20 = arith.mulf %19, %18 : vector<8x32xf32>
    %21 = math.tanh %20 : vector<8x32xf32>
    %cst_14 = arith.constant 1.000000e+00 : f32
    %22 = vector.broadcast %cst_14 : f32 to vector<8x32xf32>
    %23 = arith.addf %21, %22 : vector<8x32xf32>
    %cst_15 = arith.constant 5.000000e-01 : f32
    %24 = vector.broadcast %cst_15 : f32 to vector<8x32xf32>
    %25 = arith.mulf %24, %23 : vector<8x32xf32>
    %26 = vector.extract_strided_slice %9 {offsets = [0, 64], sizes = [8, 32], strides = [1, 1]} : vector<8x128xf32> to vector<8x32xf32>
    %27 = math.tanh %26 : vector<8x32xf32>
    %28 = vector.extract_strided_slice %9 {offsets = [0, 96], sizes = [8, 32], strides = [1, 1]} : vector<8x128xf32> to vector<8x32xf32>
    %cst_16 = arith.constant 5.000000e-01 : f32
    %29 = vector.broadcast %cst_16 : f32 to vector<8x32xf32>
    %30 = arith.mulf %29, %28 : vector<8x32xf32>
    %31 = math.tanh %30 : vector<8x32xf32>
    %cst_17 = arith.constant 1.000000e+00 : f32
    %32 = vector.broadcast %cst_17 : f32 to vector<8x32xf32>
    %33 = arith.addf %31, %32 : vector<8x32xf32>
    %cst_18 = arith.constant 5.000000e-01 : f32
    %34 = vector.broadcast %cst_18 : f32 to vector<8x32xf32>
    %35 = arith.mulf %34, %33 : vector<8x32xf32>
    %c0_19 = arith.constant 0 : index
    %c0_20 = arith.constant 0 : index
    %36 = vector.load %arg3[%c0_19, %c0_20] : memref<8x32xf32, #tpu.memory_space<vmem>>, vector<8x32xf32>
    %37 = arith.mulf %25, %36 : vector<8x32xf32>
    %38 = arith.mulf %17, %27 : vector<8x32xf32>
    %39 = arith.addf %37, %38 : vector<8x32xf32>
    %40 = math.tanh %39 : vector<8x32xf32>
    %41 = arith.mulf %35, %40 : vector<8x32xf32>
    %c0_21 = arith.constant 0 : index
    %c0_22 = arith.constant 0 : index
    %42 = vector.load %arg7[%c0_21, %c0_22] : memref<8x32xf32, #tpu.memory_space<vmem>>, vector<8x32xf32>
    tpu.vector_store %arg7[%c0_21, %c0_22], %41 {strides = array<i32>} : memref<8x32xf32, #tpu.memory_space<vmem>>, vector<8x32xf32>,
    %c0_23 = arith.constant 0 : index
    %c0_24 = arith.constant 0 : index
    %43 = vector.load %arg8[%c0_23, %c0_24] : memref<8x32xf32, #tpu.memory_space<vmem>>, vector<8x32xf32>
    tpu.vector_store %arg8[%c0_23, %c0_24], %39 {strides = array<i32>} : memref<8x32xf32, #tpu.memory_space<vmem>>, vector<8x32xf32>,
    return
  }
  func.func @transform_0(%arg0: i32) -> (i32, i32) {
    %c0_i32 = arith.constant 0 : i32
    %c0_i32_0 = arith.constant 0 : i32
    return %arg0, %c0_i32 : i32, i32
  }
  func.func @transform_1(%arg0: i32) -> (i32, i32) {
    %c0_i32 = arith.constant 0 : i32
    %c0_i32_0 = arith.constant 0 : i32
    return %arg0, %c0_i32 : i32, i32
  }
  func.func @transform_2(%arg0: i32) -> (i32, i32) {
    %c0_i32 = arith.constant 0 : i32
    %c0_i32_0 = arith.constant 0 : i32
    return %arg0, %c0_i32 : i32, i32
  }
  func.func @transform_3(%arg0: i32) -> (i32, i32) {
    %c0_i32 = arith.constant 0 : i32
    %c0_i32_0 = arith.constant 0 : i32
    %c0_i32_1 = arith.constant 0 : i32
    return %c0_i32, %c0_i32_0 : i32, i32
  }
  func.func @transform_4(%arg0: i32) -> (i32, i32) {
    %c0_i32 = arith.constant 0 : i32
    %c0_i32_0 = arith.constant 0 : i32
    %c0_i32_1 = arith.constant 0 : i32
    return %c0_i32, %c0_i32_0 : i32, i32
  }
  func.func @transform_5(%arg0: i32) -> (i32, i32) {
    %c0_i32 = arith.constant 0 : i32
    %c0_i32_0 = arith.constant 0 : i32
    %c0_i32_1 = arith.constant 0 : i32
    return %c0_i32, %c0_i32_0 : i32, i32
  }
  func.func @transform_6(%arg0: i32) -> (i32, i32) {
    %c0_i32 = arith.constant 0 : i32
    %c0_i32_0 = arith.constant 0 : i32
    return %arg0, %c0_i32 : i32, i32
  }
  func.func @transform_7(%arg0: i32) -> (i32, i32) {
    %c0_i32 = arith.constant 0 : i32
    %c0_i32_0 = arith.constant 0 : i32
    return %arg0, %c0_i32 : i32, i32
  }
}

</mosaic_0001>

<bundles_post_ra>
// kernel: tpu_custom_call.1
= control target key start
LH: loop header
LB: loop body
LE: loop exit
PB: predicated region body
PF: predicated region fallthrough
CT: control target
= control target key end

     0   :  { %13 = vsyncpa [#allocation3], 0  ;;  %s510_s0 = inlined_call_operand.hbm [shape: f32[8,16], index: 0, kind: input, shape index: {}]   ;;  %s511_s1 = inlined_call_operand.hbm [shape: f32[8,32], index: 1, kind: input, shape index: {}]   ;;  %s512_s2 = inlined_call_operand.hbm [shape: f32[8,32], index: 2, kind: input, shape index: {}]   ;;  %s513_s3 = inlined_call_operand.hbm [shape: f32[16,128], index: 3, kind: input, shape index: {}]   ;;  %s514_s4 = inlined_call_operand.hbm [shape: f32[32,128], index: 4, kind: input, shape index: {}]   ;;  %s515_s5 = inlined_call_operand.vmem [shape: f32[1,128], index: 5, kind: input, shape index: {}]   ;;  %s516_s6 = inlined_call_operand.hbm [shape: f32[8,32], index: 6, kind: output, shape index: {0}]   ;;  %s517_s7 = inlined_call_operand.hbm [shape: f32[8,32], index: 7, kind: output, shape index: {1}]  }
   0x1   :  { %14 = vsyncpa [#allocation6], 0 }
   0x2   :  { %15 = vsyncpa [#allocation9], 0 }
   0x3   :  { %16 = vsyncpa [#allocation4], 0  ;;  %s34_s26 = sshll.u32 %s511_s1, 4  ;;  %s35_s26 = int_to_ptr.hbm [resolvable:$true] %s34_s26 }
   0x4   :  { %17 = vsyncpa [#allocation13], 0  ;;  %s431_s27 = smov [#allocation5]   ;;  %s55_s8 = sshll.u32 %s513_s3, 4  ;;  %s56_s8 = int_to_ptr.hbm [resolvable:$true] %s55_s8 }
   0x5   :  { %s36_s28 = sshll.u32 %s431_s27, 4  ;;  %s432_s9 = smov [#allocation8]   ;;  %s37_s28 = int_to_ptr.vmem [resolvable:$true] %s36_s28 }
   0x6   :  { %39 = dma.hbm_to_vmem [thread:$0]  %s35_s26, 128, %s37_s28, [#allocation6]  }
   0x7   :  { %s57_s10 = sshll.u32 %s432_s9, 4  ;;  %s433_s11 = smov 128   ;;  %s58_s10 = int_to_ptr.vmem [resolvable:$true] %s57_s10 }
   0x8   :  { %s434_s12 = smov 8   ;;  %s23_s1 = sshll.u32 %s510_s0, 4  ;;  %s24_s1 = int_to_ptr.hbm [resolvable:$true] %s23_s1 }
   0x9   :  { %63 = dma.hbm_to_vmem [thread:$0]  %s56_s8, 256, %s58_s10, [#allocation9], %s433_s11, %s433_s11, %s434_s12  }
   0xa   :  { %s435_s15 = smov [#allocation2]   ;;  %s45_s3 = sshll.u32 %s512_s2, 4  ;;  %s46_s3 = int_to_ptr.hbm [resolvable:$true] %s45_s3 }
   0xb   :  { %s25_s16 = sshll.u32 %s435_s15, 4  ;;  %s436_s19 = smov [#allocation7]   ;;  %s26_s16 = int_to_ptr.vmem [resolvable:$true] %s25_s16 }
   0xc   :  { %28 = dma.hbm_to_vmem [thread:$0]  %s24_s1, 128, %s26_s16, [#allocation3]  }
   0xd   :  { %s47_s20 = sshll.u32 %s436_s19, 4  ;;  %s68_s23 = sshll.u32 %s514_s4, 4  ;;  %s48_s20 = int_to_ptr.vmem [resolvable:$true] %s47_s20  ;;  %s69_s23 = int_to_ptr.hbm [resolvable:$true] %s68_s23 }
   0xe   :  { %50 = dma.hbm_to_vmem [thread:$0]  %s46_s3, 128, %s48_s20, [#allocation6]  }
   0xf   :  { %s437_s0 = smov [#allocation10]  }
  0x10   :  { %s70_s24 = sshll.u32 %s437_s0, 4  ;;  %s71_s24 = int_to_ptr.vmem [resolvable:$true] %s70_s24 }
  0x11   :  { %76 = dma.hbm_to_vmem [thread:$0]  %s69_s23, 512, %s71_s24, [#allocation9], %s433_s11, %s433_s11, %s434_s12  }
  0x12   :  { %421 = dma.done.wait [#allocation3], 128  }
  0x13   :  { %422 = vsyncadd [#allocation3], 4294967168 }
  0x14   :  { %423 = dma.done.wait [#allocation6], 256  }
  0x15   :  { %424 = vsyncadd [#allocation6], 4294967040 }
  0x16   :  { %425 = dma.done.wait [#allocation9], 768  }
  0x17   :  { %426 = vsyncadd [#allocation9], 4294966528  ;;  %v106_v0 = vld [vmem:[#allocation10 + $0x18] sm:$0xff]  ;;  %v105_v1 = vld [vmem:[#allocation10 + $0x10] sm:$0xff]  ;;  %vm131_vm0 = vcmask 130048   ;;  %vm107_vm1 = vcmask 261120  }
  0x18   :  { %123 = vmatpush.msra.mxu0 %v106_v0  ;;  %v101_v2 = vld [vmem:[#allocation8 + $0x8] sm:$0xff]  ;;  %v100_v3 = vld [vmem:[#allocation8] sm:$0xff]  ;;  %v104_v4 = vld [vmem:[#allocation10 + $0x8] sm:$0xff]  ;;  %s438_s25 = smov 64   ;;  %s439_s26 = smov 32  }
  0x19   :  { %149 = vmatpush.msra.mxu1 %v101_v2  ;;  %v99_v5 = vld [vmem:[#allocation2] sm:$0xff]  ;;  %v103_v6 = vld [vmem:[#allocation10] sm:$0xff]  ;;  %v165_v14 = vld [vmem:[#allocation7] sm:$0xff]  ;;  %s441_s27 = smov [#allocation11]   ;;  %s204_s8 = sshll.u32 %s516_s6, 4  ;;  %s205_s8 = int_to_ptr.hbm [resolvable:$true] %s204_s8 }
  0x1a   :  { %124 = vmatpush.msra.mxu0 %v105_v1  ;;  %v102_v7 = vld [vmem:[#allocation5] sm:$0xff]  ;;  %v246_v9 = vld [vmem:[%s515_s5] ss:$0 sm:$0xff]  ;;  %s440_s5 = smov 96   ;;  %s202_s28 = sshll.u32 %s441_s27, 4  ;;  %s203_s28 = int_to_ptr.vmem [resolvable:$true] %s202_s28 }
  0x1b   :  { %150 = vmatpush.msra.mxu1 %v100_v3  ;;  %s442_s9 = smov [#allocation12]   ;;  %s215_s13 = sshll.u32 %s517_s7, 4  ;;  %s216_s13 = int_to_ptr.hbm [resolvable:$true] %s215_s13 }
  0x1c   :  { %125 = vmatpush.msra.mxu0 %v104_v4  ;;  %233 = vmatmul.msk.f32.vlgmr.msra.gmra.mxu1 %vm131_vm0, %v99_v5  ;;  %s213_s10 = sshll.u32 %s442_s9, 4  ;;  %s214_s10 = int_to_ptr.vmem [resolvable:$true] %s213_s10 }
  0x1e   :  { %126 = vmatpush.msra.mxu0 %v103_v6 }
  0x1f   :  { %232 = vmatmul.msk.f32.vlgmr.msra.gmra.mxu0 %vm107_vm1, %v102_v7 }
  0x99   :  { %v152_v8 = vpop.f32.mrf.mxu1 }
  0x9c   :  { %v128_v10 = vpop.f32.mrf.mxu0 }
  0x9d   :  { %v153_v11 = vadd.f32 %v152_v8, %v128_v10 }
  0x9f   :  { %v159_v12 = vadd.f32 %v246_v9, %v153_v11 }
  0xa1   :  { %247 = vtanh.f32 %v159_v12  ;;  %v160_v15 = vmul.f32 0.5, %v159_v12 }
  0xa3   :  { %249 = vtanh.f32 %v160_v15 }
  0xa7   :  { %v248_v13 = vpop.eup %247 }
  0xa8   :  { %172 = vrot.lane.b32.xlu0 %v248_v13, %s438_s25 }
  0xa9   :  { %v250_v16 = vpop.eup %249 }
  0xaa   :  { %v162_v17 = vadd.f32 1.0, %v250_v16 }
  0xac   :  { %v163_v18 = vmul.f32 0.5, %v162_v17 }
  0xb0   :  { %167 = vrot.lane.b32.xlu0 %v165_v14, %s439_s26 }
 0x11a   :  { %v173_v19 = vpop.permute.xlu0 %172 }
 0x11b   :  { %v175_v20 = vmul.f32 %v173_v19, %v163_v18 }
 0x11d   :  { %177 = vrot.lane.b32.xlu1 %v175_v20, %s439_s26 }
 0x122   :  { %v168_v21 = vpop.permute.xlu0 %167 }
 0x123   :  { %v170_v22 = vmul.f32 %v168_v21, %v163_v18 }
 0x18f   :  { %v178_v23 = vpop.permute.xlu1 %177 }
 0x190   :  { %v180_v24 = vadd.f32 %v178_v23, %v170_v22 }
 0x192   :  { %251 = vtanh.f32 %v180_v24 }
 0x198   :  { %v252_v25 = vpop.eup %251 }
 0x199   :  { %183 = vrot.lane.b32.xlu1 %v252_v25, %s438_s25 }
 0x20b   :  { %v184_v26 = vpop.permute.xlu1 %183 }
 0x20c   :  { %v186_v27 = vmul.f32 %v184_v26, %v163_v18 }
 0x20e   :  { %188 = vrot.lane.b32.xlu2 %v186_v27, %s439_s26 }
 0x216   :  { %193 = vrot.lane.b32.xlu2 %v180_v24, %s440_s5 }
 0x268   :  { %v189_v28 = vpop.permute.xlu2 %188 }
 0x269   :  { %191 = vst.msk [vmem:[#allocation11] sm:$0xff] %vm107_vm1, %v189_v28 }
 0x26a   :  { %207 = dma.vmem_to_hbm [thread:$0]  %s203_s28, 128, %s205_s8, [#allocation4]  }
 0x270   :  { %v194_v29 = vpop.permute.xlu2 %193 }
 0x271   :  { %196 = vst.msk [vmem:[#allocation12] sm:$0xff] %vm107_vm1, %v194_v29 }
 0x272   :  { %218 = dma.vmem_to_hbm [thread:$0]  %s214_s10, 128, %s216_s13, [#allocation13]  }
 0x273   :  { %427 = dma.done.wait [#allocation4], 128  }
 0x274   :  { %428 = vsyncadd [#allocation4], 4294967168 }
 0x275   :  { %429 = dma.done.wait [#allocation13], 128  }
 0x276   :  { %430 = vsyncadd [#allocation13], 4294967168 }
 0x277   :  { %227 = vsyncpa [#allocation3], 1 }
 0x278   :  { %228 = vsyncpa [#allocation6], 1 }
 0x279   :  { %229 = vsyncpa [#allocation9], 1 }
 0x27a   :  { %230 = vsyncpa [#allocation4], 1 }
 0x27b   :  { %231 = vsyncpa [#allocation13], 1 }

// kernel: tpu_custom_call.1
= control target key start
LH: loop header
LB: loop body
LE: loop exit
PB: predicated region body
PF: predicated region fallthrough
CT: control target
= control target key end

     0   :  { %13 = vsyncpa [#allocation3], 0  ;;  %s510_s0 = inlined_call_operand.hbm [shape: f32[8,16], index: 0, kind: input, shape index: {}]   ;;  %s511_s1 = inlined_call_operand.hbm [shape: f32[8,32], index: 1, kind: input, shape index: {}]   ;;  %s512_s2 = inlined_call_operand.hbm [shape: f32[8,32], index: 2, kind: input, shape index: {}]   ;;  %s513_s3 = inlined_call_operand.hbm [shape: f32[16,128], index: 3, kind: input, shape index: {}]   ;;  %s514_s4 = inlined_call_operand.hbm [shape: f32[32,128], index: 4, kind: input, shape index: {}]   ;;  %s515_s5 = inlined_call_operand.vmem [shape: f32[1,128], index: 5, kind: input, shape index: {}]   ;;  %s516_s6 = inlined_call_operand.hbm [shape: f32[8,32], index: 6, kind: output, shape index: {0}]   ;;  %s517_s7 = inlined_call_operand.hbm [shape: f32[8,32], index: 7, kind: output, shape index: {1}]  }
   0x1   :  { %14 = vsyncpa [#allocation6], 0 }
   0x2   :  { %15 = vsyncpa [#allocation9], 0 }
   0x3   :  { %16 = vsyncpa [#allocation4], 0  ;;  %s34_s26 = sshll.u32 %s511_s1, 4  ;;  %s35_s26 = int_to_ptr.hbm [resolvable:$true] %s34_s26 }
   0x4   :  { %17 = vsyncpa [#allocation13], 0  ;;  %s431_s27 = smov [#allocation5]   ;;  %s55_s8 = sshll.u32 %s513_s3, 4  ;;  %s56_s8 = int_to_ptr.hbm [resolvable:$true] %s55_s8 }
   0x5   :  { %s36_s28 = sshll.u32 %s431_s27, 4  ;;  %s432_s9 = smov [#allocation8]   ;;  %s37_s28 = int_to_ptr.vmem [resolvable:$true] %s36_s28 }
   0x6   :  { %39 = dma.hbm_to_vmem [thread:$0]  %s35_s26, 128, %s37_s28, [#allocation6]  }
   0x7   :  { %s57_s10 = sshll.u32 %s432_s9, 4  ;;  %s433_s11 = smov 128   ;;  %s58_s10 = int_to_ptr.vmem [resolvable:$true] %s57_s10 }
   0x8   :  { %s434_s12 = smov 8   ;;  %s23_s1 = sshll.u32 %s510_s0, 4  ;;  %s24_s1 = int_to_ptr.hbm [resolvable:$true] %s23_s1 }
   0x9   :  { %63 = dma.hbm_to_vmem [thread:$0]  %s56_s8, 256, %s58_s10, [#allocation9], %s433_s11, %s433_s11, %s434_s12  }
   0xa   :  { %s435_s15 = smov [#allocation2]   ;;  %s45_s3 = sshll.u32 %s512_s2, 4  ;;  %s46_s3 = int_to_ptr.hbm [resolvable:$true] %s45_s3 }
   0xb   :  { %s25_s16 = sshll.u32 %s435_s15, 4  ;;  %s436_s19 = smov [#allocation7]   ;;  %s26_s16 = int_to_ptr.vmem [resolvable:$true] %s25_s16 }
   0xc   :  { %28 = dma.hbm_to_vmem [thread:$0]  %s24_s1, 128, %s26_s16, [#allocation3]  }
   0xd   :  { %s47_s20 = sshll.u32 %s436_s19, 4  ;;  %s68_s23 = sshll.u32 %s514_s4, 4  ;;  %s48_s20 = int_to_ptr.vmem [resolvable:$true] %s47_s20  ;;  %s69_s23 = int_to_ptr.hbm [resolvable:$true] %s68_s23 }
   0xe   :  { %50 = dma.hbm_to_vmem [thread:$0]  %s46_s3, 128, %s48_s20, [#allocation6]  }
   0xf   :  { %s437_s0 = smov [#allocation10]  }
  0x10   :  { %s70_s24 = sshll.u32 %s437_s0, 4  ;;  %s71_s24 = int_to_ptr.vmem [resolvable:$true] %s70_s24 }
  0x11   :  { %76 = dma.hbm_to_vmem [thread:$0]  %s69_s23, 512, %s71_s24, [#allocation9], %s433_s11, %s433_s11, %s434_s12  }
  0x12   :  { %421 = dma.done.wait [#allocation3], 128  }
  0x13   :  { %422 = vsyncadd [#allocation3], 4294967168 }
  0x14   :  { %423 = dma.done.wait [#allocation6], 256  }
  0x15   :  { %424 = vsyncadd [#allocation6], 4294967040 }
  0x16   :  { %425 = dma.done.wait [#allocation9], 768  }
  0x17   :  { %426 = vsyncadd [#allocation9], 4294966528  ;;  %v106_v0 = vld [vmem:[#allocation10 + $0x18] sm:$0xff]  ;;  %v105_v1 = vld [vmem:[#allocation10 + $0x10] sm:$0xff]  ;;  %vm131_vm0 = vcmask 130048   ;;  %vm107_vm1 = vcmask 261120  }
  0x18   :  { %123 = vmatpush.msra.mxu0 %v106_v0  ;;  %v101_v2 = vld [vmem:[#allocation8 + $0x8] sm:$0xff]  ;;  %v100_v3 = vld [vmem:[#allocation8] sm:$0xff]  ;;  %v104_v4 = vld [vmem:[#allocation10 + $0x8] sm:$0xff]  ;;  %s438_s25 = smov 64   ;;  %s439_s26 = smov 32  }
  0x19   :  { %149 = vmatpush.msra.mxu1 %v101_v2  ;;  %v99_v5 = vld [vmem:[#allocation2] sm:$0xff]  ;;  %v103_v6 = vld [vmem:[#allocation10] sm:$0xff]  ;;  %v165_v14 = vld [vmem:[#allocation7] sm:$0xff]  ;;  %s441_s27 = smov [#allocation11]   ;;  %s204_s8 = sshll.u32 %s516_s6, 4  ;;  %s205_s8 = int_to_ptr.hbm [resolvable:$true] %s204_s8 }
  0x1a   :  { %124 = vmatpush.msra.mxu0 %v105_v1  ;;  %v102_v7 = vld [vmem:[#allocation5] sm:$0xff]  ;;  %v246_v9 = vld [vmem:[%s515_s5] ss:$0 sm:$0xff]  ;;  %s440_s5 = smov 96   ;;  %s202_s28 = sshll.u32 %s441_s27, 4  ;;  %s203_s28 = int_to_ptr.vmem [resolvable:$true] %s202_s28 }
  0x1b   :  { %150 = vmatpush.msra.mxu1 %v100_v3  ;;  %s442_s9 = smov [#allocation12]   ;;  %s215_s13 = sshll.u32 %s517_s7, 4  ;;  %s216_s13 = int_to_ptr.hbm [resolvable:$true] %s215_s13 }
  0x1c   :  { %125 = vmatpush.msra.mxu0 %v104_v4  ;;  %233 = vmatmul.msk.f32.vlgmr.msra.gmra.mxu1 %vm131_vm0, %v99_v5  ;;  %s213_s10 = sshll.u32 %s442_s9, 4  ;;  %s214_s10 = int_to_ptr.vmem [resolvable:$true] %s213_s10 }
  0x1e   :  { %126 = vmatpush.msra.mxu0 %v103_v6 }
  0x1f   :  { %232 = vmatmul.msk.f32.vlgmr.msra.gmra.mxu0 %vm107_vm1, %v102_v7 }
  0x99   :  { %v152_v8 = vpop.f32.mrf.mxu1 }
  0x9c   :  { %v128_v10 = vpop.f32.mrf.mxu0 }
  0x9d   :  { %v153_v11 = vadd.f32 %v152_v8, %v128_v10 }
  0x9f   :  { %v159_v12 = vadd.f32 %v246_v9, %v153_v11 }
  0xa1   :  { %247 = vtanh.f32 %v159_v12  ;;  %v160_v15 = vmul.f32 0.5, %v159_v12 }
  0xa3   :  { %249 = vtanh.f32 %v160_v15 }
  0xa7   :  { %v248_v13 = vpop.eup %247 }
  0xa8   :  { %172 = vrot.lane.b32.xlu0 %v248_v13, %s438_s25 }
  0xa9   :  { %v250_v16 = vpop.eup %249 }
  0xaa   :  { %v162_v17 = vadd.f32 1.0, %v250_v16 }
  0xac   :  { %v163_v18 = vmul.f32 0.5, %v162_v17 }
  0xb0   :  { %167 = vrot.lane.b32.xlu0 %v165_v14, %s439_s26 }
 0x11a   :  { %v173_v19 = vpop.permute.xlu0 %172 }
 0x11b   :  { %v175_v20 = vmul.f32 %v173_v19, %v163_v18 }
 0x11d   :  { %177 = vrot.lane.b32.xlu1 %v175_v20, %s439_s26 }
 0x122   :  { %v168_v21 = vpop.permute.xlu0 %167 }
 0x123   :  { %v170_v22 = vmul.f32 %v168_v21, %v163_v18 }
 0x18f   :  { %v178_v23 = vpop.permute.xlu1 %177 }
 0x190   :  { %v180_v24 = vadd.f32 %v178_v23, %v170_v22 }
 0x192   :  { %251 = vtanh.f32 %v180_v24 }
 0x198   :  { %v252_v25 = vpop.eup %251 }
 0x199   :  { %183 = vrot.lane.b32.xlu1 %v252_v25, %s438_s25 }
 0x20b   :  { %v184_v26 = vpop.permute.xlu1 %183 }
 0x20c   :  { %v186_v27 = vmul.f32 %v184_v26, %v163_v18 }
 0x20e   :  { %188 = vrot.lane.b32.xlu2 %v186_v27, %s439_s26 }
 0x216   :  { %193 = vrot.lane.b32.xlu2 %v180_v24, %s440_s5 }
 0x268   :  { %v189_v28 = vpop.permute.xlu2 %188 }
 0x269   :  { %191 = vst.msk [vmem:[#allocation11] sm:$0xff] %vm107_vm1, %v189_v28 }
 0x26a   :  { %207 = dma.vmem_to_hbm [thread:$0]  %s203_s28, 128, %s205_s8, [#allocation4]  }
 0x270   :  { %v194_v29 = vpop.permute.xlu2 %193 }
 0x271   :  { %196 = vst.msk [vmem:[#allocation12] sm:$0xff] %vm107_vm1, %v194_v29 }
 0x272   :  { %218 = dma.vmem_to_hbm [thread:$0]  %s214_s10, 128, %s216_s13, [#allocation13]  }
 0x273   :  { %427 = dma.done.wait [#allocation4], 128  }
 0x274   :  { %428 = vsyncadd [#allocation4], 4294967168 }
 0x275   :  { %429 = dma.done.wait [#allocation13], 128  }
 0x276   :  { %430 = vsyncadd [#allocation13], 4294967168 }
 0x277   :  { %227 = vsyncpa [#allocation3], 1 }
 0x278   :  { %228 = vsyncpa [#allocation6], 1 }
 0x279   :  { %229 = vsyncpa [#allocation9], 1 }
 0x27a   :  { %230 = vsyncpa [#allocation4], 1 }
 0x27b   :  { %231 = vsyncpa [#allocation13], 1 }

</bundles_post_ra>
